<compile_context>
chip_gen: v6e
topology: v6e:2x2x1
jax: 0.10.0
libtpu: 0.0.40
codegen_flags: <defaults>
</compile_context>

<pallas_src>
import numpy as np
import jax
import jax.numpy as jnp
from jax.experimental import pallas as pl
from jax.experimental.pallas import tpu as pltpu

_LANE = 128
_SUBLANE = 8
_TARGET_BLOCK_BYTES = 4 * 1024 * 1024      # ~4 MiB per x/out tile
_VMEM_LIMIT_BYTES = 48 * 1024 * 1024       # explicit scoped-VMEM budget (usage ~<=32 MiB)


def make_positional_encoding(d_model: int, max_seq_length: int = 5000,
                             dtype=jnp.float32) -> jnp.ndarray:
    """Sinusoidal PE table, shape (max_seq_length, d_model), built once in `dtype`."""
    position = np.arange(0, max_seq_length, dtype=np.float32)[:, None]            # (L, 1)
    div_term = np.exp(np.arange(0, d_model, 2, dtype=np.float32)
                      * (-np.log(10000.0) / d_model))                              # (D/2,)
    pe = np.zeros((max_seq_length, d_model), dtype=np.float32)
    pe[:, 0::2] = np.sin(position * div_term)
    pe[:, 1::2] = np.cos(position * div_term)
    return jnp.asarray(pe, dtype=dtype)


def _round_up(x: int, m: int) -> int:
    return (x + m - 1) // m * m


def _sublane_pack(dtype) -> int:
    """Rows per packed sublane tile: 8 for f32, 16 for bf16, 32 for int8/fp8."""
    return _SUBLANE * max(1, 4 // jnp.dtype(dtype).itemsize)


def _add_pe_kernel(x_ref, pe_ref, o_ref):
    # Works for both paths: pe block is either (1, TF) (broadcast over batch
    # rows) or (TR, TD) (same shape).  Cast is a no-op when dtypes match.
    o_ref[...] = x_ref[...] + pe_ref[...].astype(o_ref.dtype)


def positional_encoding_forward(x: jnp.ndarray, pe: jnp.ndarray, *,
                                donate_x: bool = False) -> jnp.ndarray:
    """x: (B, S, D); pe: (max_L, D) [or (1, max_L, D)]. Returns x + pe[:S] per batch."""
    B, S, D = x.shape
    if pe.ndim == 3:                      # accept the PyTorch-style (1, max_L, D) buffer
        pe = pe.reshape(pe.shape[-2], pe.shape[-1])
    max_L, pe_D = pe.shape
    assert pe_D == D, f"d_model mismatch: x has {D}, pe has {pe_D}"
    assert max_L >= S, f"seq_len {S} exceeds pe table length {max_L}"

    itemsize = jnp.dtype(x.dtype).itemsize
    pack = _sublane_pack(x.dtype)
    aliases = {0: 0} if donate_x else {}
    cparams = pltpu.CompilerParams(
        dimension_semantics=("parallel", "parallel"),
        vmem_limit_bytes=_VMEM_LIMIT_BYTES,
    )

    if B == 1:
        # ---- Row path (common inference shape): sublane-dense (S, D) tiles. ----
        x2 = x.reshape(S, D)
        TD = _round_up(D, _LANE)
        TR = (_TARGET_BLOCK_BYTES // (TD * itemsize)) // pack * pack
        if TR < pack:                                     # absurdly wide D: cap TD instead
            TD = max(_LANE, (_TARGET_BLOCK_BYTES // (pack * itemsize)) // _LANE * _LANE)
            TR = pack
        TR = max(pack, min(TR, _round_up(S, pack)))
        TD = min(TD, _round_up(D, _LANE))
        nr, nc = pl.cdiv(S, TR), pl.cdiv(D, TD)
        if nr * nc < 2:                                   # keep both v7x TCs busy
            if S > pack:
                TR = max(pack, _round_up(pl.cdiv(S, 2), pack))
            elif D > _LANE:
                TD = max(_LANE, _round_up(pl.cdiv(D, 2), _LANE))
            nr, nc = pl.cdiv(S, TR), pl.cdiv(D, TD)

        out2 = pl.pallas_call(
            _add_pe_kernel,
            out_shape=jax.ShapeDtypeStruct((S, D), x.dtype),
            grid=(nr, nc),
            in_specs=[
                pl.BlockSpec((TR, TD), lambda r, c: (r, c)),   # activations (S, D)
                pl.BlockSpec((TR, TD), lambda r, c: (r, c)),   # pe table (max_L, D); only rows < S touched
            ],
            out_specs=pl.BlockSpec((TR, TD), lambda r, c: (r, c)),
            compiler_params=cparams,
            input_output_aliases=aliases,
        )(x2, pe)
        return out2.reshape(B, S, D)

    # ---- Flat path (B >= 2): lane-dense (B, S*D) tiles, pe reused across batch. ----
    SD = S * D
    x2 = x.reshape(B, SD)                     # contiguous reshape: free under jit
    pe2 = pe.reshape(1, max_L * D)            # full-table reshape: no slice, no cast

    TB = B if B <= pack else pack             # dtype-aware sublane packing (full-dim if small)
    TF = (_TARGET_BLOCK_BYTES // (TB * itemsize)) // _LANE * _LANE
    TF = max(_LANE, min(TF, _round_up(SD, _LANE)))
    nf, nb = pl.cdiv(SD, TF), pl.cdiv(B, TB)
    if nf * nb < 2 and SD > _LANE:            # keep both v7x TCs busy
        TF = max(_LANE, _round_up(pl.cdiv(SD, 2), _LANE))
        nf = pl.cdiv(SD, TF)

    out2 = pl.pallas_call(
        _add_pe_kernel,
        out_shape=jax.ShapeDtypeStruct((B, SD), x.dtype),
        # Batch axis innermost: pe's block index is constant across it, so each
        # pe tile is DMA'd once per flat tile and reused for every batch tile.
        grid=(nf, nb),
        in_specs=[
            pl.BlockSpec((TB, TF), lambda f, b: (b, f)),   # activations
            pl.BlockSpec((1, TF), lambda f, b: (0, f)),    # pe (first S*D columns only)
        ],
        out_specs=pl.BlockSpec((TB, TF), lambda f, b: (b, f)),
        compiler_params=cparams,
        input_output_aliases=aliases,
    )(x2, pe2)
    return out2.reshape(B, S, D)


if __name__ == "__main__":
    # Check 1: module-consistent small shape (batch=2, seq=8, d_model=32) -> flat path.
    key = jax.random.PRNGKey(0)
    x = jax.random.normal(key, (2, 8, 32), dtype=jnp.float32)
    pe = make_positional_encoding(32, 64)
    out = jax.block_until_ready(positional_encoding_forward(x, pe))
    ref = x + pe[None, :8, :]
    np.testing.assert_allclose(np.asarray(out), np.asarray(ref), rtol=1e-6, atol=1e-6)

    # Check 2: batch > sublane pack, ragged batch tile, d_model not 128-aligned.
    x2 = jax.random.normal(jax.random.PRNGKey(1), (10, 12, 20), dtype=jnp.float32)
    pe2 = make_positional_encoding(20, 32)
    out2 = jax.block_until_ready(positional_encoding_forward(x2, pe2))
    ref2 = x2 + pe2[None, :12, :]
    np.testing.assert_allclose(np.asarray(out2), np.asarray(ref2), rtol=1e-6, atol=1e-6)

    # Check 3: batch == 1 (inference shape) -> sublane-dense row path.
    x3 = jax.random.normal(jax.random.PRNGKey(2), (1, 16, 32), dtype=jnp.float32)
    pe3 = make_positional_encoding(32, 64)
    out3 = jax.block_until_ready(positional_encoding_forward(x3, pe3))
    ref3 = x3 + pe3[None, :16, :]
    np.testing.assert_allclose(np.asarray(out3), np.asarray(ref3), rtol=1e-6, atol=1e-6)

    # Check 4: bf16 activations with a bf16-constructed pe table (no per-call cast).
    x4 = jax.random.normal(jax.random.PRNGKey(3), (4, 8, 32), dtype=jnp.bfloat16)
    pe4 = make_positional_encoding(32, 16, dtype=jnp.bfloat16)
    out4 = jax.block_until_ready(positional_encoding_forward(x4, pe4))
    ref4 = x4 + pe4[None, :8, :]
    np.testing.assert_allclose(np.asarray(out4.astype(jnp.float32)),
                               np.asarray(ref4.astype(jnp.float32)),
                               rtol=1e-2, atol=1e-2)

    print("KERNEL_OK")
</pallas_src>

<mosaic_0001>
module attributes {stable_mosaic.version = 11 : i64} {
  func.func @_add_pe_kernel(%arg0: i32, %arg1: i32, %arg2: memref<2x128xf32, #tpu.memory_space<vmem>>, %arg3: memref<1x128xf32, #tpu.memory_space<vmem>>, %arg4: memref<2x128xf32, #tpu.memory_space<vmem>>) attributes {dimension_semantics = [#tpu.dimension_semantics<parallel>, #tpu.dimension_semantics<parallel>], iteration_bounds = array<i64: 2, 1>, scalar_prefetch = 0 : i64, scratch_operands = 0 : i64, tpu.core_type = #tpu.core_type<tc>, window_params = [{transform_indices = @transform_0, window_bounds = array<i64: 2, 128>}, {transform_indices = @transform_1, window_bounds = array<i64: 1, 128>}, {transform_indices = @transform_2, window_bounds = array<i64: 2, 128>}]} {
    %c0 = arith.constant 0 : index
    %c0_0 = arith.constant 0 : index
    %0 = vector.load %arg2[%c0, %c0_0] : memref<2x128xf32, #tpu.memory_space<vmem>>, vector<2x128xf32>
    %c0_1 = arith.constant 0 : index
    %c0_2 = arith.constant 0 : index
    %1 = vector.load %arg3[%c0_1, %c0_2] : memref<1x128xf32, #tpu.memory_space<vmem>>, vector<1x128xf32>
    %2 = vector.broadcast %1 : vector<1x128xf32> to vector<2x128xf32>
    %3 = arith.addf %0, %2 : vector<2x128xf32>
    %c0_3 = arith.constant 0 : index
    %c0_4 = arith.constant 0 : index
    %4 = vector.load %arg4[%c0_3, %c0_4] : memref<2x128xf32, #tpu.memory_space<vmem>>, vector<2x128xf32>
    tpu.vector_store %arg4[%c0_3, %c0_4], %3 {strides = array<i32>} : memref<2x128xf32, #tpu.memory_space<vmem>>, vector<2x128xf32>,
    return
  }
  func.func @transform_0(%arg0: i32, %arg1: i32) -> (i32, i32) {
    %c0_i32 = arith.constant 0 : i32
    return %arg1, %arg0 : i32, i32
  }
  func.func @transform_1(%arg0: i32, %arg1: i32) -> (i32, i32) {
    %c0_i32 = arith.constant 0 : i32
    %c0_i32_0 = arith.constant 0 : i32
    return %c0_i32, %arg0 : i32, i32
  }
  func.func @transform_2(%arg0: i32, %arg1: i32) -> (i32, i32) {
    %c0_i32 = arith.constant 0 : i32
    return %arg1, %arg0 : i32, i32
  }
}

</mosaic_0001>

<bundles_post_ra>
// kernel: tpu_custom_call.1
= control target key start
LH: loop header
LB: loop body
LE: loop exit
PB: predicated region body
PF: predicated region fallthrough
CT: control target
= control target key end

     0   :  { %7 = vsyncpa [#allocation3], 0  ;;  %s745_s0 = inlined_call_operand.hbm [shape: f32[2,256], index: 0, kind: input, shape index: {}]   ;;  %s746_s1 = inlined_call_operand.hbm [shape: f32[1,2048], index: 1, kind: input, shape index: {}]   ;;  %s747_s2 = inlined_call_operand.hbm [shape: f32[2,256], index: 2, kind: output, shape index: {}]  }
   0x1   :  { %9 = vsyncpa [#allocation3 + $0x1], 0 }
   0x2   :  { %10 = vsyncpa [#allocation6], 0 }
   0x3   :  { %12 = vsyncpa [#allocation6 + $0x1], 0 }
   0x4   :  { %13 = vsyncpa [#allocation4], 0 }
   0x5   :  { %15 = vsyncpa [#allocation4 + $0x1], 0  ;;  %s581_s9 = smov 0   ;;  %s583_s10 = smov 0  }
   0x6   :  { %s585_s11 = smov 0   ;;  %s587_s12 = smov 0  }
   0x7   :  { %s589_s13 = smov 0   ;;  %s591_s14 = smov 0  }
   0x8 LB: > { %s339_s15 = sadd.s32 4294967295, %s561_s14   ;;  %s340_s16 = sadd.s32 4294967294, %s561_s14   ;;  %s561_s14 = sphi %s591_s14, %s21_s14   ;;  %s557_s13 = sphi %s589_s13, %s759_s13   ;;  %s553_s12 = sphi %s587_s12, %s758_s12   ;;  %s549_s11 = sphi %s585_s11, %s757_s11   ;;  %s545_s10 = sphi %s583_s10, %s756_s10   ;;  %s541_s9 = sphi %s581_s9, %s755_s9  }
   0x9   : > { %s33_s17 = sadd.s32 1, %s557_s13  ;;  %s42_s18 = sadd.s32 1, %s549_s11 }
   0xa   : > { %p35_p0 = scmp.ge.s32.totalorder %s33_s17, 2  ;;  %p49_p1 = scmp.ne.s32.totalorder %s549_s11, %s545_s10 }
   0xb   : > { %p50_p2 = scmp.eq.s32.totalorder %s561_s14, 0  ;;  %p55_p3 = scmp.ne.s32.totalorder %s545_s10, %s541_s9 }
   0xc   : > { %s761_s17 = smov (%p35_p0, %s33_s17), 0  ;;  %p56_p5 = scmp.eq.s32.totalorder %s339_s15, 0 }
   0xd   : > { %p622_p4 = por %p50_p2, %p49_p1  ;;  %s38_s20 = ssub.s32 %s557_s13, %s761_s17 }
   0xe   : > { %p107_p6 = scmp.eq.s32.totalorder %s339_s15, 1  ;;  %p40_p7 = scmp.eq.s32.totalorder %s38_s20, 0 }
   0xf   : > { %p628_p8 = por %p56_p5, %p55_p3  ;;  %p113_p10 = scmp.eq.s32.totalorder %s340_s16, 1 }
  0x10   : > { %p632_p9 = por %p107_p6, %p49_p1  ;;  %p371_p13 = scmp.lt.s32.totalorder %s561_s14, 2 }
  0x11   : > { %s637_s23 = scalar_select %p40_p7, %s549_s11, %s42_s18  }
  0x12   : > { %p639_p11 = por %p113_p10, %p55_p3  ;;  %s646_s25 = sand.u32 1, %s549_s11  }
  0x13   : > { %s343_s26 = sshll.u32 %s646_s25, 1  ;;  %s344_s27 = sshll.u32 %s557_s13, 5 }
  0x14   : > { %s144_s30 = scalar_lea.hbm %s745_s0, %s344_s27  ;;  %s137_s3 = scalar_lea.vmem [#allocation2], %s343_s26 }
  0x15   : > { %s146_s4 = sshll.u32 %s137_s3, 4  ;;  %p655_p0 = pnand %p371_p13, %p622_p4  ;;  %s147_s4 = int_to_ptr.vmem [resolvable:$true] %s146_s4 }
  0x16   : > { %p346_p1 = scmp.ge.s32.totalorder %s561_s14, 1  ;;  %p168_p2 = scmp.lt.s32.totalorder %s561_s14, 3 }
  0x17   : > { %s134_s6 = scalar_lea.sflag [#allocation3], %s646_s25  ;;  %p423_p3 = pneg %p655_p0 }
  0x18   : > { %s434_s7 = scalar_lea.vmem %s147_s4, 32  ;;  %s563_s8 = smov [#allocation2]  }
  0x19   : > { %p435_p5 = scmp.ne.s32.totalorder %s147_s4, %s434_s7  ;;  %s439_s15 = sshll.u32 %s563_s8, 4  ;;  %s440_s15 = int_to_ptr.vmem [resolvable:$false] %s439_s15 }
  0x1a   : > { %s441_s16 = scalar_lea.vmem %s440_s15, 64  ;;  %p442_p4 = scmp.lt.s32.totalorder %s147_s4, %s440_s15 }
  0x1b   : > { %p437_p6 = pnand %p435_p5, %p423_p3  ;;  %p443_p10 = scmp.lt.s32.totalorder %s441_s16, %s434_s7 }
  0x1d   : > { %p438_p7 = pneg %p437_p6  ;;  %p444_p13 = por %p443_p10, %p442_p4 }
  0x1f   : > { %p445_p12 = pnand %p444_p13, %p438_p7 }
  0x21   : > { %448 = shalt.err (!%p445_p12)
}
  0x22   : > { %363 = dma.hbm_to_vmem [thread:$0]  (!%p655_p0), %s144_s30, 32, %s147_s4, %s134_s6  }
  0x23   : > { %p673_p5 = pnand %p346_p1, %p168_p2  ;;  %s345_s19 = sshll.u32 %s557_s13, 4 }
  0x24   : > { %s156_s20 = scalar_lea.vmem [#allocation5], %s646_s25  ;;  %s161_s29 = scalar_lea.hbm %s746_s1, %s345_s19 }
  0x25   : > { %s163_s26 = sshll.u32 %s156_s20, 4  ;;  %s154_s3 = scalar_lea.sflag [#allocation6], %s646_s25  ;;  %s164_s26 = int_to_ptr.vmem [resolvable:$true] %s163_s26 }
  0x26   : > { %s462_s7 = scalar_lea.vmem %s164_s26, 16  ;;  %s564_s30 = smov [#allocation5]  }
  0x27   : > { %p463_p12 = scmp.ne.s32.totalorder %s164_s26, %s462_s7  ;;  %s467_s4 = sshll.u32 %s564_s30, 4  ;;  %s468_s4 = int_to_ptr.vmem [resolvable:$false] %s467_s4 }
  0x28   : > { %s469_s6 = scalar_lea.vmem %s468_s4, 32  ;;  %p470_p1 = scmp.lt.s32.totalorder %s164_s26, %s468_s4 }
  0x29   : > { %p465_p6 = pnand %p463_p12, %p423_p3  ;;  %p471_p2 = scmp.lt.s32.totalorder %s469_s6, %s462_s7 }
  0x2b   : > { %p466_p7 = pneg %p465_p6  ;;  %p472_p4 = por %p471_p2, %p470_p1 }
  0x2d   : > { %p473_p10 = pnand %p472_p4, %p466_p7 }
  0x2f   : > { %476 = shalt.err (!%p473_p10)
}
  0x30   : > { %366 = dma.hbm_to_vmem [thread:$0]  (!%p655_p0), %s161_s29, 16, %s164_s26, %s154_s3  }
  0x31   : > { %172 = sbr.rel (%p673_p5) target bundleno = 81 (0x51), region = 28  ;;  %s691_s25 = sand.u32 (!%p673_p5), 1, %s545_s10  }
  0x32   : > { %s347_s8 = sshll.u32 (!%p673_p5), %s691_s25, 1  ;;  %s175_s15 = scalar_lea.sflag (!%p673_p5), [#allocation3], %s691_s25 }
  0x33   : > { %s178_s16 = scalar_lea.vmem (!%p673_p5), [#allocation2], %s347_s8 }
  0x36   : > { %528 = dma.done.wait (%p628_p8), %s175_s15, 32  }
  0x37   : > { %530 = vsyncadd (%p628_p8), %s175_s15, 4294967264  ;;  %s184_s5 = scalar_lea.sflag [#allocation6], %s691_s25  ;;  %s186_s18 = scalar_lea.vmem [#allocation5], %s691_s25 }
  0x38   : > { %532 = dma.done.wait (%p628_p8), %s184_s5, 16  }
  0x39   : > { %534 = vsyncadd (%p628_p8), %s184_s5, 4294967280  ;;  %s210_s19 = scalar_lea.vmem [#allocation7], %s347_s8  ;;  %s351_s26 = sshll.u32 %s553_s12, 5  ;;  %v211_v0 = vld [vmem:[%s178_s16] sm:$0x3] }
  0x3a   : > { %s237_s20 = sshll.u32 %s210_s19, 4  ;;  %v349_v1 = vld [vmem:[%s186_s18] ss:$0 sm:$0xff]  ;;  %s235_s29 = scalar_lea.hbm %s747_s2, %s351_s26  ;;  %s238_s20 = int_to_ptr.vmem [resolvable:$true] %s237_s20 }
  0x3b   : > { %v219_v2 = vadd.f32 %v349_v1, %v211_v0  ;;  %s222_s3 = scalar_lea.sflag [#allocation4], %s691_s25  ;;  %s477_s7 = scalar_lea.vmem %s238_s20, 32 }
  0x3c   : > { %p478_p0 = scmp.ne.s32.totalorder %s238_s20, %s477_s7  ;;  %s565_s21 = smov [#allocation7]  }
  0x3d   : > { %220 = vst [vmem:[%s210_s19] sm:$0x3] %v219_v2  ;;  %s481_s30 = sshll.u32 %s565_s21, 4  ;;  %s482_s30 = int_to_ptr.vmem [resolvable:$false] %s481_s30 }
  0x3e   : > { %p479_p8 = pnand %p478_p0, %p632_p9  ;;  %s483_s4 = scalar_lea.vmem %s482_s30, 64 }
  0x3f   : > { %p484_p13 = scmp.lt.s32.totalorder %s238_s20, %s482_s30  ;;  %p485_p5 = scmp.lt.s32.totalorder %s483_s4, %s477_s7 }
  0x40   : > { %p480_p3 = pneg %p479_p8 }
  0x41   : > { %p486_p12 = por %p485_p5, %p484_p13 }
  0x43   : > { %p487_p6 = pnand %p486_p12, %p480_p3 }
  0x45   : > { %490 = shalt.err (!%p487_p6)
}
  0x46   : > { %s491_s12 = scalar_lea.hbm %s235_s29, 32  ;;  %s495_s8 = scalar_lea.hbm %s747_s2, 64 }
  0x47   : > { %p492_p7 = scmp.ne.s32.totalorder %s235_s29, %s491_s12  ;;  %p496_p4 = scmp.lt.s32.totalorder %s235_s29, %s747_s2 }
  0x48   : > { %p497_p10 = scmp.lt.s32.totalorder %s495_s8, %s491_s12 }
  0x49   : > { %p493_p1 = pnand %p492_p7, %p632_p9 }
  0x4a   : > { %p498_p0 = por %p497_p10, %p496_p4 }
  0x4b   : > { %p494_p2 = pneg %p493_p1 }
  0x4d   : > { %p499_p8 = pnand %p498_p0, %p494_p2 }
  0x4f   : > { %502 = shalt.err (!%p499_p8)
}
  0x50   : > { %358 = dma.vmem_to_hbm [thread:$0]  (%p632_p9), %s238_s20, 32, %s235_s29, %s222_s3  }
  0x51 PF: > { %s249_s5 = sand.u32 1, %s541_s9   ;;  %p754_p3 = scmp.ge.s32.totalorder %s561_s14, 2 }
  0x52   : > { %s250_s18 = scalar_lea.sflag [#allocation4], %s249_s5 }
  0x53   : > { %p368_p13 = pnand %p754_p3, %p639_p11 }
  0x55   : > { %p369_p5 = pneg %p368_p13 }
  0x57   : > { %536 = dma.done.wait (%p369_p5), %s250_s18, 32  }
  0x58   : > { %538 = vsyncadd (%p369_p5), %s250_s18, 4294967264  ;;  %s21_s14 = sadd.s32 1, %s561_s14   ;;  %s755_s9 = smov %s545_s10 }
  0x59   : > { %p18_p12 = scmp.ge.s32.totalorder %s21_s14, 4   ;;  %s756_s10 = smov %s549_s11 }
  0x5a   : > { %s757_s11 = smov %s637_s23  ;;  %s758_s12 = smov %s557_s13 }
  0x5b   : > { %s759_s13 = smov %s761_s17  ;;  %20 = sbr.rel (!%p18_p12) target bundleno = 8 (0x8), region = 86 }
  0x60   :  { %255 = vsyncpa [#allocation3], 1 }
  0x61   :  { %257 = vsyncpa [#allocation3 + $0x1], 1 }
  0x62   :  { %258 = vsyncpa [#allocation6], 1 }
  0x63   :  { %260 = vsyncpa [#allocation6 + $0x1], 1 }
  0x64   :  { %261 = vsyncpa [#allocation4], 1 }
  0x65   :  { %263 = vsyncpa [#allocation4 + $0x1], 1 }

</bundles_post_ra>
